<compile_context>
chip_gen: v7x
topology: tpu7x:2x2x1
jax: 0.10.0
libtpu: 0.0.40
codegen_flags: <defaults>
</compile_context>

<pallas_src>
import jax
import jax.numpy as jnp
from jax import lax
from jax.experimental import pallas as pl
from jax.experimental.pallas import tpu as pltpu

SUBLANE = 8


def _round_up(x: int, m: int) -> int:
    return ((x + m - 1) // m) * m


def _linear_kernel(x_ref, w_ref, b_ref, o_ref):
    # x: (TM, D_in)  w: (D_in, D_out)  b: (1, D_out)  o: (TM, D_out)
    # Canonical (M,K)x(K,N) form -> straight MXU matmul, f32 accumulate,
    # no in-kernel transpose of the weight tile.
    acc = jnp.dot(x_ref[...], w_ref[...], preferred_element_type=jnp.float32)
    o_ref[...] = (acc + b_ref[...]).astype(o_ref.dtype)


def logistic_regression_forward(x, weight, bias, *, block_rows=2048,
                                use_bf16=True, out_dtype=jnp.float32):
    """x: (B, D_in), weight: (D_out, D_in), bias: (D_out,) -> (B, D_out)."""
    B, D_in = x.shape
    D_out = weight.shape[0]

    in_dtype = jnp.bfloat16 if use_bf16 else x.dtype

    # Row tiling: multiple of 8 sublanes. Pick tm so that (a) each step is big
    # enough to amortize per-grid-step overhead and (b) row padding is only a
    # few sublanes (never a near-full tile).
    B8 = _round_up(B, SUBLANE)
    n_tiles = max(1, pl.cdiv(B8, block_rows))
    tm = _round_up(pl.cdiv(B8, n_tiles), SUBLANE)
    B_p = tm * n_tiles

    x_p = x.astype(in_dtype)
    if B_p != B:
        x_p = jnp.pad(x_p, ((0, B_p - B), (0, 0)))

    # Pre-transpose W once in XLA: kernel sees (D_in, D_out), stays resident
    # in VMEM across all batch tiles (tiny), bias likewise.
    w_t = jnp.transpose(weight).astype(in_dtype)          # (D_in, D_out)
    b2 = bias.reshape(1, D_out).astype(jnp.float32)       # (1, D_out)

    itemsize = jnp.dtype(in_dtype).itemsize
    out_itemsize = jnp.dtype(out_dtype).itemsize
    cost = pl.CostEstimate(
        flops=2 * B * D_in * D_out,
        transcendentals=0,
        bytes_accessed=(B * D_in * itemsize          # x
                        + D_in * D_out * itemsize    # W (one pass)
                        + D_out * 4                  # bias
                        + B * D_out * out_itemsize), # out
    )

    out = pl.pallas_call(
        _linear_kernel,
        out_shape=jax.ShapeDtypeStruct((B_p, D_out), out_dtype),
        grid=(n_tiles,),
        in_specs=[
            pl.BlockSpec((tm, D_in), lambda i: (i, 0)),      # x: tiled over batch
            pl.BlockSpec((D_in, D_out), lambda i: (0, 0)),   # W^T: resident
            pl.BlockSpec((1, D_out), lambda i: (0, 0)),      # bias: resident
        ],
        out_specs=pl.BlockSpec((tm, D_out), lambda i: (i, 0)),
        compiler_params=pltpu.CompilerParams(
            # Batch tiles are independent -> megacore split on v7x (no-op on
            # v5e/v6e single-TC chips).
            dimension_semantics=("parallel",),
        ),
        cost_estimate=cost,
    )(x_p, w_t, b2)

    return out if B_p == B else out[:B]


if __name__ == "__main__":
    # Small shapes consistent with the module: batch=8, input_dim=32, output_dim=16.
    input_dim, output_dim, batch = 32, 16, 8

    key = jax.random.PRNGKey(0)
    kx, kw, kb = jax.random.split(key, 3)

    # Deterministic parameter init matching torch.nn.Linear's U(-1/sqrt(in), 1/sqrt(in)).
    bound = 1.0 / (input_dim ** 0.5)
    weight = jax.random.uniform(kw, (output_dim, input_dim), jnp.float32, -bound, bound)
    bias = jax.random.uniform(kb, (output_dim,), jnp.float32, -bound, bound)
    x = jax.random.normal(kx, (batch, input_dim), jnp.float32)

    ref = x @ weight.T + bias

    # Bit-tight f32 path.
    out_f32 = logistic_regression_forward(x, weight, bias, use_bf16=False)
    jax.block_until_ready(out_f32)
    assert out_f32.shape == (batch, output_dim)
    assert jnp.allclose(out_f32, ref, atol=1e-5, rtol=1e-5)

    # Default bf16-operand path (f32 accumulate) -> quantization-level error.
    out_bf16 = logistic_regression_forward(x, weight, bias, use_bf16=True)
    jax.block_until_ready(out_bf16)
    assert out_bf16.shape == (batch, output_dim)
    assert jnp.allclose(out_bf16, ref, atol=2e-2, rtol=2e-2)

    print("KERNEL_OK")
</pallas_src>

<mosaic_0001>
module attributes {stable_mosaic.version = 11 : i64} {
  func.func @_linear_kernel(%arg0: i32, %arg1: memref<8x32xf32, #tpu.memory_space<vmem>>, %arg2: memref<32x16xf32, #tpu.memory_space<vmem>>, %arg3: memref<1x16xf32, #tpu.memory_space<vmem>>, %arg4: memref<8x16xf32, #tpu.memory_space<vmem>>) attributes {dimension_semantics = [#tpu.dimension_semantics<parallel>], iteration_bounds = array<i64: 1>, scalar_prefetch = 0 : i64, scratch_operands = 0 : i64, tpu.core_type = #tpu.core_type<tc>, window_params = [{transform_indices = @transform_0, window_bounds = array<i64: 8, 32>}, {pipeline_mode = #tpu.pipeline_mode<synchronous>, transform_indices = @transform_1, window_bounds = array<i64: 32, 16>}, {pipeline_mode = #tpu.pipeline_mode<synchronous>, transform_indices = @transform_2, window_bounds = array<i64: 1, 16>}, {transform_indices = @transform_3, window_bounds = array<i64: 8, 16>}]} {
    %c0 = arith.constant 0 : index
    %c0_0 = arith.constant 0 : index
    %0 = vector.load %arg1[%c0, %c0_0] : memref<8x32xf32, #tpu.memory_space<vmem>>, vector<8x32xf32>
    %c0_1 = arith.constant 0 : index
    %c0_2 = arith.constant 0 : index
    %1 = vector.load %arg2[%c0_1, %c0_2] : memref<32x16xf32, #tpu.memory_space<vmem>>, vector<32x16xf32>
    %cst = arith.constant dense<0.000000e+00> : vector<8x16xf32>
    %2 = tpu.matmul %0, %1, %cst {dimension_numbers = #tpu.dot_dimension_numbers<[1], [0], [0], [1], [0, 0, 1, 1], [], []>} : vector<8x32xf32>, vector<32x16xf32>, vector<8x16xf32> -> vector<8x16xf32>
    %c0_3 = arith.constant 0 : index
    %c0_4 = arith.constant 0 : index
    %3 = vector.load %arg3[%c0_3, %c0_4] : memref<1x16xf32, #tpu.memory_space<vmem>>, vector<1x16xf32>
    %4 = vector.broadcast %3 : vector<1x16xf32> to vector<8x16xf32>
    %5 = arith.addf %2, %4 : vector<8x16xf32>
    %c0_5 = arith.constant 0 : index
    %c0_6 = arith.constant 0 : index
    %6 = vector.load %arg4[%c0_5, %c0_6] : memref<8x16xf32, #tpu.memory_space<vmem>>, vector<8x16xf32>
    tpu.vector_store %arg4[%c0_5, %c0_6], %5 {strides = array<i32>} : memref<8x16xf32, #tpu.memory_space<vmem>>, vector<8x16xf32>,
    return
  }
  func.func @transform_0(%arg0: i32) -> (i32, i32) {
    %c0_i32 = arith.constant 0 : i32
    %c0_i32_0 = arith.constant 0 : i32
    return %arg0, %c0_i32 : i32, i32
  }
  func.func @transform_1(%arg0: i32) -> (i32, i32) {
    %c0_i32 = arith.constant 0 : i32
    %c0_i32_0 = arith.constant 0 : i32
    %c0_i32_1 = arith.constant 0 : i32
    return %c0_i32, %c0_i32_0 : i32, i32
  }
  func.func @transform_2(%arg0: i32) -> (i32, i32) {
    %c0_i32 = arith.constant 0 : i32
    %c0_i32_0 = arith.constant 0 : i32
    %c0_i32_1 = arith.constant 0 : i32
    return %c0_i32, %c0_i32_0 : i32, i32
  }
  func.func @transform_3(%arg0: i32) -> (i32, i32) {
    %c0_i32 = arith.constant 0 : i32
    %c0_i32_0 = arith.constant 0 : i32
    return %arg0, %c0_i32 : i32, i32
  }
}

</mosaic_0001>

<bundles_post_ra>
// kernel: tpu_custom_call.1
= control target key start
LH: loop header
LB: loop body
LE: loop exit
PB: predicated region body
PF: predicated region fallthrough
CT: control target
= control target key end

     0   :  { %v169_v3 = vmov 0.0|0.0   ;;  %vm170_vm0 = vmmov 0   ;;  %v171_v6 = vmov 0.0   ;;  %s223_s0 = inlined_call_operand.vmem [shape: f32[8,32], index: 0, kind: input, shape index: {}]   ;;  %s224_s1 = inlined_call_operand.vmem [shape: f32[32,16], index: 1, kind: input, shape index: {}]   ;;  %s225_s2 = inlined_call_operand.vmem [shape: f32[1,16], index: 2, kind: input, shape index: {}]   ;;  %s226_s3 = inlined_call_operand.hbm [shape: f32[8,16], index: 3, kind: output, shape index: {}]  }
   0x1   :  { %v16_v0 = vld [vmem:[%s224_s1] sm:$0xff]  ;;  %v17_v1 = vld [vmem:[%s224_s1 + $0x8] sm:$0xff]  ;;  %v18_v2 = vld [vmem:[%s224_s1 + $0x10] sm:$0xff]  ;;  %135 = vmatprep.subr.bf16.mxu0 %v169_v3  ;;  %132 = vmatprep.mubr.msk.f32.mxu0 %vm170_vm0, %v171_v6 }
   0x2   :  { %v136_v4 = vpack.c.bf16 %v17_v1, %v16_v0  ;;  %v19_v5 = vld [vmem:[%s224_s1 + $0x18] sm:$0xff] }
   0x3   :  { %8 = vsyncpa [#allocation3], 0  ;;  %v139_v7 = vpack.c.bf16 %v19_v5, %v18_v2  ;;  %v15_v8 = vld [vmem:[%s223_s0] sm:$0xff]  ;;  %vm27_vm1 = vcmask 261120   ;;  %s172_s24 = smov [#allocation2]   ;;  %vm101_vm2 = vcmask 130048  }
   0x4   :  { %137 = vmatpush3.bf16.msra.mxu0 %v136_v4  ;;  %v117_v9 = vld [vmem:[%s225_s2] ss:$0 sm:$0xff]  ;;  %s109_s1 = sshll.u32 %s172_s24, 4  ;;  %s110_s1 = int_to_ptr.vmem [resolvable:$true] %s109_s1 }
   0x5   :  { %138 = vmatprep.subr.bf16.mxu0 %v169_v3  ;;  %s145_s25 = scalar_lea.vmem %s110_s1, 128  ;;  %p150_p1 = scmp.lt.s32.totalorder %s110_s1, %s110_s1 }
   0x6   :  { %p146_p0 = scmp.ne.s32.totalorder %s110_s1, %s145_s25  ;;  %p151_p2 = scmp.lt.s32.totalorder %s145_s25, %s145_s25 }
   0x8   :  { %140 = vmatpush3.bf16.msra.mxu0 %v139_v7  ;;  %p152_p3 = por %p151_p2, %p150_p1 }
   0xa   :  { %p153_p4 = pnand %p152_p3, %p146_p0 }
   0xb   :  { %133 = vmatmul.mubr.msk.f32.vlgmr.msra.gmra.mrb[0].mxu0 %vm27_vm1, %v15_v8 }
  0xde   :  { %v97_v10 = vpop.f32.mrb[0].mxu0 }
  0xdf   :  { %v98_v11 = vadd.f32 %v117_v9, %v97_v10  ;;  %v134_v12 = vpop.f32.mrb[1].mxu0 }
  0xe1   :  { %102 = vst.msk [vmem:[#allocation2] sm:$0xff] %vm101_vm2, %v98_v11 }
  0xe2   :  { %156 = shalt.err (!%p153_p4)
}
  0xe3   :  { %s157_s27 = scalar_lea.hbm %s226_s3, 128 }
  0xe4   :  { %p158_p5 = scmp.ne.s32.totalorder %s226_s3, %s157_s27  ;;  %p161_p6 = scmp.lt.u32.totalorder %s157_s27, %s226_s3 }
  0xe6   :  { %p163_p7 = pnand %p161_p6, %p158_p5 }
  0xe8   :  { %166 = shalt.err (!%p163_p7)
}
  0xe9   :  { %112 = dma.vmem_to_hbm [thread:$0]  %s110_s1, 128, %s226_s3, [#allocation3]  }
  0xea   :  { %167 = dma.done.wait [#allocation3], 128  }
  0xeb   :  { %168 = vsyncadd [#allocation3], 4294967168 }
  0xec   :  { %116 = vsyncpa [#allocation3], 1 }

</bundles_post_ra>
